<compile_context>
chip_gen: v7x
topology: tpu7x:2x2x1
jax: 0.10.0
libtpu: 0.0.40
codegen_flags: <defaults>
</compile_context>

<pallas_src>
import math
from functools import partial

import jax
import jax.numpy as jnp
from jax.experimental import pallas as pl
from jax.experimental.pallas import tpu as pltpu


def _cdiv(a, b):
    return (a + b - 1) // b


def _round_up(a, b):
    return _cdiv(a, b) * b


def _rotary_cache_kernel(inv_freq_lane_ref, freq_table_ref, cos_ref, sin_ref,
                         *, positions_per_tile):
    """Compute one slab tile of the rotary cos/sin cache.

    inv_freq_lane_ref: (1, W) f32, inv_freq/ratio in the slab lane layout
                       (cat([f, f]) tiled `r` times), constant across the grid.
    freq_table_ref:    (TS, W) f32, (row*r + lane//dim) * inv_freq_lane,
                       constant across the grid (resident in VMEM).
    cos_ref/sin_ref:   (TS, W) output tiles, W = r * dim.
    """
    # Absolute-position offset of this tile, folded through inv_freq:
    #   freqs = (base + row*r + lane_off) * inv  =  table + base * inv
    base = (pl.program_id(0) * positions_per_tile).astype(jnp.float32)
    freqs = freq_table_ref[...] + base * inv_freq_lane_ref[...]
    # f32 math; cast only at the store (kernel emits consumer dtype directly).
    cos_ref[...] = jnp.cos(freqs).astype(cos_ref.dtype)
    sin_ref[...] = jnp.sin(freqs).astype(sin_ref.dtype)


def build_rotary_cache(inv_freq, max_seq, ratio, *, out_dtype=jnp.float32,
                       max_tile_rows=1024):
    """Build a rotary cos/sin cache covering at least `max_seq` positions.

    Returns (cos, sin) of shape (padded_positions, dim) with
    padded_positions >= max_seq.  No trailing slice is performed here (the
    caller slices to the seq_len it needs), so the kernel's HBM writes are the
    only cache traffic.
    """
    half = int(inv_freq.shape[0])
    dim = 2 * half

    # Lane-dense packing: r consecutive positions per slab row so the output
    # last dim is a multiple of 128 lanes (full, unmasked stores) for any dim.
    r = 128 // math.gcd(dim, 128)
    width = r * dim

    slab_rows = _cdiv(max_seq, r)
    sublane = 32  # covers f32 / bf16 / 8-bit sublane packing granularities

    # Clamp tile rows by a conservative VMEM budget:
    #   freq table (1 buffer, f32) + 2 outputs x 2 pipeline buffers.
    out_itemsize = jnp.dtype(out_dtype).itemsize
    per_row_bytes = width * 4 + 2 * 2 * width * out_itemsize
    vmem_budget = 12 * 1024 * 1024
    cap = max(sublane, (vmem_budget // per_row_bytes) // sublane * sublane)
    max_tile_rows = min(max_tile_rows, cap)

    # Pick tile_rows from the number of tiles (keeps padding minimal and the
    # per-step work balanced).
    n_tiles = max(1, _cdiv(slab_rows, max_tile_rows))
    if n_tiles == 1 and slab_rows >= 4 * sublane:
        n_tiles = 2  # let megacore chips (v7x) shard the grid across 2 TCs
    tile_rows = _round_up(_cdiv(slab_rows, n_tiles), sublane)
    padded_rows = n_tiles * tile_rows

    if padded_rows * r >= (1 << 24):
        # Positions are generated in f32; exact integers only up to 2^24.
        raise ValueError(
            f"rotary cache of {padded_rows * r} positions exceeds f32 exact "
            "integer range (2^24)")

    # One-time lane/row tables (computed outside the kernel, constant across
    # the grid; their BlockSpecs use a constant index_map so they stay
    # resident in VMEM).
    inv_scaled = inv_freq.astype(jnp.float32) / jnp.float32(ratio)
    inv_freq_lane = jnp.tile(
        jnp.concatenate([inv_scaled, inv_scaled]), r).reshape(1, width)
    lane_off = jnp.repeat(jnp.arange(r, dtype=jnp.float32), dim)[None, :]
    row_pos = (jnp.arange(tile_rows, dtype=jnp.float32) * jnp.float32(r))[:, None]
    freq_table = (row_pos + lane_off) * inv_freq_lane  # (tile_rows, width)

    kernel = partial(_rotary_cache_kernel,
                     positions_per_tile=tile_rows * r)
    cos_slab, sin_slab = pl.pallas_call(
        kernel,
        out_shape=(
            jax.ShapeDtypeStruct((padded_rows, width), out_dtype),
            jax.ShapeDtypeStruct((padded_rows, width), out_dtype),
        ),
        grid_spec=pltpu.PrefetchScalarGridSpec(
            num_scalar_prefetch=0,
            grid=(n_tiles,),
            in_specs=[
                pl.BlockSpec((1, width), lambda i: (0, 0)),
                pl.BlockSpec((tile_rows, width), lambda i: (0, 0)),
            ],
            out_specs=[
                pl.BlockSpec((tile_rows, width), lambda i: (i, 0)),
                pl.BlockSpec((tile_rows, width), lambda i: (i, 0)),
            ],
        ),
        compiler_params=pltpu.CompilerParams(
            dimension_semantics=("parallel",),
        ),
    )(inv_freq_lane, freq_table)

    # Slab (padded_rows, r*dim) -> (padded_rows*r, dim): contiguous row-major
    # reshape, i.e. a free bitcast.  No slice -> no extra HBM pass.
    cos = cos_slab.reshape(padded_rows * r, dim)
    sin = sin_slab.reshape(padded_rows * r, dim)
    return cos, sin


class CondenseRotaryEmbedding:
    """JAX/Pallas port of the PyTorch CondenseRotaryEmbedding module."""

    def __init__(self, dim, ratio, max_position_embeddings=2048, base=10000,
                 dtype=jnp.float32):
        self.dim = dim
        self.ratio = ratio
        self.base = base
        self.inv_freq = 1.0 / (
            base ** (jnp.arange(0, dim, 2, dtype=jnp.float32) / dim)
        )
        max_position_embeddings *= ratio
        print(
            f"Condensing Positional embeddings from {max_position_embeddings} "
            f"to {max_position_embeddings // ratio}"
        )
        self.max_seq_len_cached = max_position_embeddings
        self._default_dtype = jnp.dtype(dtype)
        self._caches = {}  # per-dtype memoized (cos, sin) caches (padded)
        cos, sin = self._get_cache(self._default_dtype)
        # mirror the torch (1, 1, L, dim) buffers; L may exceed
        # max_seq_len_cached because the padded slab is kept (forward slices).
        self.cos_cached = cos[None, None]
        self.sin_cached = sin[None, None]

    def _get_cache(self, dtype):
        dtype = jnp.dtype(dtype)
        if dtype not in self._caches:
            # kernel emits directly in the consumer dtype (no per-call astype)
            self._caches[dtype] = build_rotary_cache(
                self.inv_freq, self.max_seq_len_cached, self.ratio,
                out_dtype=dtype)
        return self._caches[dtype]

    def __call__(self, x, seq_len=None):
        # NOTE: like the PyTorch module, this does host-side (non-jit) cache
        # management; seq_len must be a concrete Python int here.
        if seq_len is None:
            seq_len = x.shape[-2]
        seq_len = int(seq_len)
        if seq_len > self.max_seq_len_cached:
            self.max_seq_len_cached = seq_len
            self._caches = {}
            cos, sin = self._get_cache(self._default_dtype)
            self.cos_cached = cos[None, None]
            self.sin_cached = sin[None, None]
        cos, sin = self._get_cache(jnp.dtype(x.dtype))
        # hot path: pure slice, no dtype conversion
        return cos[None, None, :seq_len, :], sin[None, None, :seq_len, :]


def _reference(inv_freq, max_seq, ratio, seq_len, dtype):
    t = jnp.arange(max_seq, dtype=jnp.float32) / ratio
    freqs = jnp.einsum("i,j->ij", t, inv_freq)
    emb = jnp.concatenate([freqs, freqs], axis=-1)
    cos = jnp.cos(emb)[None, None, :seq_len, :].astype(dtype)
    sin = jnp.sin(emb)[None, None, :seq_len, :].astype(dtype)
    return cos, sin


if __name__ == "__main__":
    # small shapes: head dim = 32, condense ratio = 2, max positions = 16 -> cache len 32
    dim = 32
    ratio = 2
    max_position_embeddings = 16
    seq_len = 8

    key = jax.random.PRNGKey(0)
    # x only supplies dtype/shape context (as in the PyTorch forward): (b, h, seq, dim)
    x = jax.random.normal(key, (2, 4, seq_len, dim), dtype=jnp.float32)

    rope = CondenseRotaryEmbedding(dim, ratio, max_position_embeddings)
    cos, sin = rope(x, seq_len=seq_len)
    cos = jax.block_until_ready(cos)
    sin = jax.block_until_ready(sin)

    ref_cos, ref_sin = _reference(
        rope.inv_freq, max_position_embeddings * ratio, ratio, seq_len, x.dtype
    )

    assert cos.shape == (1, 1, seq_len, dim) and sin.shape == (1, 1, seq_len, dim)
    assert jnp.allclose(cos, ref_cos, atol=1e-5, rtol=1e-5)
    assert jnp.allclose(sin, ref_sin, atol=1e-5, rtol=1e-5)

    print("KERNEL_OK")
</pallas_src>

<mosaic_0001>
module attributes {stable_mosaic.version = 11 : i64} {
  func.func @_rotary_cache_kernel(%arg0: i32, %arg1: memref<1x128xf32, #tpu.memory_space<vmem>>, %arg2: memref<32x128xf32, #tpu.memory_space<vmem>>, %arg3: memref<32x128xf32, #tpu.memory_space<vmem>>, %arg4: memref<32x128xf32, #tpu.memory_space<vmem>>) attributes {dimension_semantics = [#tpu.dimension_semantics<parallel>], iteration_bounds = array<i64: 1>, scalar_prefetch = 0 : i64, scratch_operands = 0 : i64, tpu.core_type = #tpu.core_type<tc>, window_params = [{pipeline_mode = #tpu.pipeline_mode<synchronous>, transform_indices = @transform_0, window_bounds = array<i64: 1, 128>}, {pipeline_mode = #tpu.pipeline_mode<synchronous>, transform_indices = @transform_1, window_bounds = array<i64: 32, 128>}, {transform_indices = @transform_2, window_bounds = array<i64: 32, 128>}, {transform_indices = @transform_3, window_bounds = array<i64: 32, 128>}]} {
    %c128_i32 = arith.constant 128 : i32
    %0 = arith.muli %arg0, %c128_i32 : i32
    %1 = arith.sitofp %0 : i32 to f32
    %c0 = arith.constant 0 : index
    %c0_0 = arith.constant 0 : index
    %2 = vector.load %arg2[%c0, %c0_0] : memref<32x128xf32, #tpu.memory_space<vmem>>, vector<32x128xf32>
    %c0_1 = arith.constant 0 : index
    %c0_2 = arith.constant 0 : index
    %3 = vector.load %arg1[%c0_1, %c0_2] : memref<1x128xf32, #tpu.memory_space<vmem>>, vector<1x128xf32>
    %4 = vector.broadcast %1 : f32 to vector<1x128xf32>
    %5 = arith.mulf %4, %3 : vector<1x128xf32>
    %6 = vector.broadcast %5 : vector<1x128xf32> to vector<32x128xf32>
    %7 = arith.addf %2, %6 : vector<32x128xf32>
    %8 = math.cos %7 : vector<32x128xf32>
    %c0_3 = arith.constant 0 : index
    %c0_4 = arith.constant 0 : index
    %9 = vector.load %arg3[%c0_3, %c0_4] : memref<32x128xf32, #tpu.memory_space<vmem>>, vector<32x128xf32>
    tpu.vector_store %arg3[%c0_3, %c0_4], %8 {strides = array<i32>} : memref<32x128xf32, #tpu.memory_space<vmem>>, vector<32x128xf32>,
    %10 = math.sin %7 : vector<32x128xf32>
    %c0_5 = arith.constant 0 : index
    %c0_6 = arith.constant 0 : index
    %11 = vector.load %arg4[%c0_5, %c0_6] : memref<32x128xf32, #tpu.memory_space<vmem>>, vector<32x128xf32>
    tpu.vector_store %arg4[%c0_5, %c0_6], %10 {strides = array<i32>} : memref<32x128xf32, #tpu.memory_space<vmem>>, vector<32x128xf32>,
    return
  }
  func.func @transform_0(%arg0: i32) -> (i32, i32) {
    %c0_i32 = arith.constant 0 : i32
    %c0_i32_0 = arith.constant 0 : i32
    %c0_i32_1 = arith.constant 0 : i32
    return %c0_i32, %c0_i32_0 : i32, i32
  }
  func.func @transform_1(%arg0: i32) -> (i32, i32) {
    %c0_i32 = arith.constant 0 : i32
    %c0_i32_0 = arith.constant 0 : i32
    %c0_i32_1 = arith.constant 0 : i32
    return %c0_i32, %c0_i32_0 : i32, i32
  }
  func.func @transform_2(%arg0: i32) -> (i32, i32) {
    %c0_i32 = arith.constant 0 : i32
    %c0_i32_0 = arith.constant 0 : i32
    return %arg0, %c0_i32 : i32, i32
  }
  func.func @transform_3(%arg0: i32) -> (i32, i32) {
    %c0_i32 = arith.constant 0 : i32
    %c0_i32_0 = arith.constant 0 : i32
    return %arg0, %c0_i32 : i32, i32
  }
}

</mosaic_0001>

<bundles_post_ra>
// kernel: tpu_custom_call.1
= control target key start
LH: loop header
LB: loop body
LE: loop exit
PB: predicated region body
PF: predicated region fallthrough
CT: control target
= control target key end

     0   :  { %9 = vsyncpa [#allocation3], 0  ;;  %s1538_s0 = inlined_call_operand.hbm [shape: f32[1,128], index: 0, kind: input, shape index: {}]   ;;  %s1539_s1 = inlined_call_operand.hbm [shape: f32[32,128], index: 1, kind: input, shape index: {}]   ;;  %s1540_s2 = inlined_call_operand.hbm [shape: f32[32,128], index: 2, kind: output, shape index: {0}]   ;;  %s1541_s3 = inlined_call_operand.hbm [shape: f32[32,128], index: 3, kind: output, shape index: {1}]  }
   0x1   :  { %10 = vsyncpa [#allocation6], 0 }
   0x2   :  { %11 = vsyncpa [#allocation4], 0 }
   0x3   :  { %12 = vsyncpa [#allocation9], 0  ;;  %s1102_s12 = smov [#allocation2]   ;;  %s1103_s14 = smov [#allocation5]  }
   0x4   :  { %s19_s13 = sshll.u32 %s1102_s12, 4  ;;  %s28_s15 = sshll.u32 %s1103_s14, 4  ;;  %s20_s13 = int_to_ptr.vmem [resolvable:$true] %s19_s13  ;;  %s1134_s15 = int_to_ptr.vmem [resolvable:$true] %s28_s15 }
   0x5   :  { %s1006_s18 = scalar_lea.hbm %s1538_s0, 16 }
   0x6   :  { %p1007_p0 = scmp.ne.s32.totalorder %s1538_s0, %s1006_s18  ;;  %p1010_p1 = scmp.lt.u32.totalorder %s1006_s18, %s1538_s0 }
   0x8   :  { %p1012_p2 = pnand %p1010_p1, %p1007_p0 }
   0xa   :  { %1015 = shalt.err (!%p1012_p2)
}
   0xb   :  { %s1016_s23 = scalar_lea.vmem %s20_s13, 16  ;;  %s1020_s24 = scalar_lea.vmem %s20_s13, 32 }
   0xc   :  { %p1017_p3 = scmp.ne.s32.totalorder %s20_s13, %s1016_s23  ;;  %p1021_p4 = scmp.lt.s32.totalorder %s20_s13, %s20_s13 }
   0xd   :  { %p1022_p5 = scmp.lt.s32.totalorder %s1020_s24, %s1016_s23 }
   0xf   :  { %p1023_p6 = por %p1022_p5, %p1021_p4 }
  0x11   :  { %p1024_p7 = pnand %p1023_p6, %p1017_p3 }
  0x13   :  { %1027 = shalt.err (!%p1024_p7)
}
  0x14   :  { %22 = dma.hbm_to_vmem [thread:$0]  %s1538_s0, 16, %s20_s13, [#allocation3]  }
  0x15   :  { %s1028_s29 = scalar_lea.hbm %s1539_s1, 512 }
  0x16   :  { %p1029_p8 = scmp.ne.s32.totalorder %s1539_s1, %s1028_s29  ;;  %p1032_p9 = scmp.lt.u32.totalorder %s1028_s29, %s1539_s1 }
  0x18   :  { %p1034_p10 = pnand %p1032_p9, %p1029_p8 }
  0x1a   :  { %1037 = shalt.err (!%p1034_p10)
}
  0x1b   :  { %s1038_s7 = scalar_lea.vmem %s1134_s15, 512  ;;  %p1043_p12 = scmp.lt.s32.totalorder %s1134_s15, %s1134_s15 }
  0x1c   :  { %p1039_p11 = scmp.ne.s32.totalorder %s1134_s15, %s1038_s7  ;;  %p1044_p13 = scmp.lt.s32.totalorder %s1038_s7, %s1038_s7 }
  0x1e   :  { %p1045_p0 = por %p1044_p13, %p1043_p12 }
  0x20   :  { %p1046_p1 = pnand %p1045_p0, %p1039_p11 }
  0x22   :  { %1049 = shalt.err (!%p1046_p1)
}
  0x23   :  { %s1104_s0 = smov 128   ;;  %s1105_s8 = smov 8  }
  0x24   :  { %34 = dma.hbm_to_vmem [thread:$0]  %s1539_s1, 512, %s1134_s15, [#allocation6], %s1104_s0, %s1104_s0, %s1105_s8  }
  0x25   :  { %1094 = dma.done.wait [#allocation3], 16  }
  0x26   :  { %1095 = vsyncadd [#allocation3], 4294967280 }
  0x27   :  { %1096 = dma.done.wait [#allocation6], 512  }
  0x28   :  { %1097 = vsyncadd [#allocation6], 4294966784  ;;  %v51_v0 = vlaneseq  ;;  %v47_v3 = vld [vmem:[#allocation2] sm:$0x1]  ;;  %v43_v5 = vld [vmem:[#allocation5] sm:$0xff]  ;;  %s1112_s1 = smov [#allocation7]  }
  0x29   :  { %v49_v4 = vmul.f32 0.0, %v47_v3  ;;  %v44_v6 = vld [vmem:[#allocation5 + $0x8] sm:$0xff]  ;;  %v45_v8 = vld [vmem:[#allocation5 + $0x10] sm:$0xff]  ;;  %v46_v25 = vld [vmem:[#allocation5 + $0x18] sm:$0xff]  ;;  %v1106_v41 = vmov 683565275  }
  0x2a   :  { %v52_v1 = vshrl.u32 %v51_v0, 7  ;;  %v1107_v43 = vmov 2475754826   ;;  %v1108_v45 = vmov 2131351028   ;;  %s901_s11 = sshll.u32 %s1112_s1, 4  ;;  %s902_s11 = int_to_ptr.vmem [resolvable:$true] %s901_s11 }
  0x2b   :  { %v1109_v47 = vmov 2102212464   ;;  %v1110_v49 = vmov 920167782   ;;  %v1111_v57 = vmov 1326507024   ;;  %p1055_p3 = scmp.lt.s32.totalorder %s902_s11, %s902_s11 }
  0x2c   :  { %v53_v2 = vsub.s32 0, %v52_v1  ;;  %s1113_s12 = smov [#allocation8]   ;;  %s1050_s14 = scalar_lea.vmem %s902_s11, 512 }
  0x2d   :  { %s913_s13 = sshll.u32 %s1113_s12, 4  ;;  %p1051_p2 = scmp.ne.s32.totalorder %s902_s11, %s1050_s14  ;;  %s1501_s13 = int_to_ptr.vmem [resolvable:$true] %s913_s13 }
  0x2e   :  { %v54_v7 = vrot.slane %v49_v4, %v53_v2  ;;  %p1056_p4 = scmp.lt.s32.totalorder %s1050_s14, %s1050_s14 }
  0x30   :  { %v1168_v9 = vadd.f32 %v54_v7, %v43_v5  ;;  %v1170_v10 = vadd.f32 %v54_v7, %v44_v6  ;;  %v1172_v11 = vadd.f32 %v54_v7, %v45_v8  ;;  %v1183_v31 = vadd.f32 %v54_v7, %v46_v25  ;;  %p1057_p5 = por %p1056_p4, %p1055_p3 }
  0x32   :  { %v60_v12 = vand.u32 2147483647, %v1168_v9  ;;  %v63_v13 = vand.u32 2139095040, %v1168_v9  ;;  %v163_v14 = vand.u32 2147483647, %v1170_v10  ;;  %v166_v15 = vand.u32 2139095040, %v1170_v10  ;;  %p1058_p6 = pnand %p1057_p5, %p1051_p2 }
  0x33   :  { %v269_v20 = vand.u32 2139095040, %v1172_v11  ;;  %v266_v35 = vand.u32 2147483647, %v1172_v11 }
  0x34   :  { %v64_v16 = vshrl.u32 %v63_v13, 23  ;;  %v67_v17 = vand.u32 8388607, %v60_v12  ;;  %v167_v18 = vshrl.u32 %v166_v15, 23  ;;  %v170_v19 = vand.u32 8388607, %v163_v14 }
  0x35   :  { %v270_v23 = vshrl.u32 %v269_v20, 23 }
  0x36   :  { %v930_v21 = vadd.s32 4294967169, %v64_v16  ;;  %v934_v22 = vadd.s32 4294967169, %v167_v18  ;;  %v68_v26 = vor.u32 8388608, %v67_v17  ;;  %v171_v27 = vor.u32 8388608, %v170_v19 }
  0x37   :  { %v938_v29 = vadd.s32 4294967169, %v270_v23 }
  0x38   :  { %v70_v24 = vadd.s32 1, %v930_v21  ;;  %v173_v28 = vadd.s32 1, %v934_v22  ;;  %v1186_v36 = vshll.u32 %v68_v26, 8  ;;  %v1188_v38 = vshll.u32 %v171_v27, 8 }
  0x39   :  { %v1190_v39 = vadd.s32 1, %v938_v29 }
  0x3a   :  { %vm71_vm0 = vcmp.gt.s32.totalorder %v70_v24, 0  ;;  %vm174_vm1 = vcmp.gt.s32.totalorder %v173_v28, 0 }
  0x3b   :  { %v72_v30 = vsel %vm71_vm0, %v70_v24, 0  ;;  %v175_v34 = vsel %vm174_vm1, %v173_v28, 0  ;;  %vm277_vm6 = vcmp.gt.s32.totalorder %v1190_v39, 0  ;;  %vm62_vm0 = vcmp.lt.s32.totalorder %v1168_v9, 0 }
  0x3c   :  { %v73_v32 = vshrl.u32 %v72_v30, 5  ;;  %v74_v33 = vand.u32 31, %v72_v30  ;;  %v177_v37 = vand.u32 31, %v175_v34  ;;  %v1197_v51 = vshrl.u32 %v175_v34, 5 }
  0x3e   :  { %v75_v40 = vsub.s32 32, %v74_v33  ;;  %v77_v42 = vshll.u32 %v1106_v41, %v74_v33  ;;  %v80_v44 = vshll.u32 %v1107_v43, %v74_v33  ;;  %v83_v46 = vshll.u32 %v1108_v45, %v74_v33 }
  0x3f   :  { %v86_v48 = vshll.u32 %v1109_v47, %v74_v33  ;;  %v89_v50 = vshll.u32 %v1110_v49, %v74_v33  ;;  %vm92_vm2 = vcmp.lt.s32.totalorder %v73_v32, 1  ;;  %vm93_vm3 = vcmp.lt.s32.totalorder %v73_v32, 2 }
  0x40   :  { %v76_v52 = vshrl.u32 %v1106_v41, %v75_v40  ;;  %v78_v53 = vshrl.u32 %v1107_v43, %v75_v40  ;;  %v81_v54 = vshrl.u32 %v1108_v45, %v75_v40  ;;  %v84_v55 = vshrl.u32 %v1109_v47, %v75_v40 }
  0x41   :  { %v87_v56 = vshrl.u32 %v1110_v49, %v75_v40  ;;  %v90_v58 = vshrl.u32 %v1111_v57, %v75_v40  ;;  %vm95_vm4 = vcmp.lt.s32.totalorder %v73_v32, 4  ;;  %v178_v62 = vsub.s32 32, %v177_v37 }
  0x42   :  { %v79_v59 = vor.u32 %v78_v53, %v77_v42  ;;  %v82_v60 = vor.u32 %v81_v54, %v80_v44  ;;  %v85_v61 = vor.u32 %v84_v55, %v83_v46  ;;  %vm94_vm5 = vcmp.lt.s32.totalorder %v73_v32, 3 }
  0x43   :  { %v88_v63 = vor.u32 %v87_v56, %v86_v48  ;;  %v91_v0 = vor.u32 %v90_v58, %v89_v50  ;;  %v180_v1 = vshll.u32 %v1106_v41, %v177_v37  ;;  %v183_v13 = vshll.u32 %v1107_v43, %v177_v37 }
  0x44   :  { %v96_v2 = vsel %vm92_vm2, %v76_v52, %v79_v59  ;;  %v97_v3 = vsel %vm95_vm4, %v85_v61, 2102212464  ;;  %v100_v4 = vsel %vm92_vm2, %v79_v59, %v82_v60  ;;  %v104_v5 = vsel %vm92_vm2, %v82_v60, %v85_v61 }
  0x45   :  { %v98_v6 = vsel %vm94_vm5, %v82_v60, %v97_v3  ;;  %v101_v7 = vsel %vm95_vm4, %v88_v63, 920167782  ;;  %v105_v8 = vsel %vm95_vm4, %v91_v0, 1326507024  ;;  %v179_v17 = vshrl.u32 %v1106_v41, %v178_v62 }
  0x46   :  { %v102_v15 = vsel %vm94_vm5, %v85_v61, %v101_v7  ;;  %v106_v16 = vsel %vm94_vm5, %v88_v63, %v105_v8  ;;  %v181_v18 = vshrl.u32 %v1107_v43, %v178_v62  ;;  %v99_v19 = vsel %vm93_vm3, %v96_v2, %v98_v6 }
  0x47   :  { %v103_v20 = vsel %vm93_vm3, %v100_v4, %v102_v15  ;;  %v107_v21 = vsel %vm93_vm3, %v104_v5, %v106_v16  ;;  %v184_v22 = vshrl.u32 %v1108_v45, %v178_v62  ;;  %v186_v29 = vshll.u32 %v1108_v45, %v177_v37 }
  0x48   :  { %v1218_v23 = vmul.u32.u64.low %v1186_v36, %v107_v21  ;;  %v1219_v24 = vmul.u32.u64.high %v1186_v36, %v107_v21, %v1218_v23  ;;  %v1222_v25 = vmul.u32.u64.low %v1186_v36, %v103_v20  ;;  %v1223_v26 = vmul.u32.u64.high %v1186_v36, %v103_v20, %v1222_v25 }
  0x49   :  { %v182_v27 = vor.u32 %v181_v18, %v180_v1  ;;  %v185_v28 = vor.u32 %v184_v22, %v183_v13  ;;  %v187_v30 = vshrl.u32 %v1109_v47, %v178_v62  ;;  %v189_v32 = vshll.u32 %v1109_v47, %v177_v37 }
  0x4a   :  { %v190_v33 = vshrl.u32 %v1110_v49, %v178_v62  ;;  %v192_v34 = vshll.u32 %v1110_v49, %v177_v37  ;;  %v193_v40 = vshrl.u32 %v1111_v57, %v178_v62  ;;  %v115_v42 = vmul.u32 %v1186_v36, %v99_v19 }
  0x4b   :  { %v188_v44 = vor.u32 %v187_v30, %v186_v29  ;;  %vm195_vm7 = vcmp.lt.s32.totalorder %v1197_v51, 1  ;;  %vm196_vm8 = vcmp.lt.s32.totalorder %v1197_v51, 2  ;;  %vm117_vm9 = vc.u32 %v1219_v24, %v1222_v25 }
  0x4c   :  { %v118_v46 = vadd.s32 1, %v1223_v26  ;;  %v191_v48 = vor.u32 %v190_v33, %v189_v32  ;;  %vm197_vm10 = vcmp.lt.s32.totalorder %v1197_v51, 3  ;;  %v194_v50 = vor.u32 %v193_v40, %v192_v34 }
  0x4d   :  { %vm198_vm11 = vcmp.lt.s32.totalorder %v1197_v51, 4  ;;  %v199_v37 = vsel %vm195_vm7, %v179_v17, %v182_v27  ;;  %v203_v52 = vsel %vm195_vm7, %v182_v27, %v185_v28  ;;  %v207_v55 = vsel %vm195_vm7, %v185_v28, %v188_v44 }
  0x4e   :  { %v119_v36 = vsel %vm117_vm9, %v118_v46, %v1223_v26  ;;  %v200_v53 = vsel %vm198_vm11, %v188_v44, 2102212464  ;;  %v204_v54 = vsel %vm198_vm11, %v191_v48, 920167782  ;;  %v208_v60 = vsel %vm198_vm11, %v194_v50, 1326507024 }
  0x4f   :  { %v120_v56 = vadd.s32 %v119_v36, %v115_v42  ;;  %v201_v58 = vsel %vm197_vm10, %v185_v28, %v200_v53  ;;  %v205_v59 = vsel %vm197_vm10, %v188_v44, %v204_v54  ;;  %v209_v63 = vsel %vm197_vm10, %v191_v48, %v208_v60 }
  0x50   :  { %v202_v61 = vsel %vm196_vm8, %v199_v37, %v201_v58  ;;  %v206_v62 = vsel %vm196_vm8, %v203_v52, %v205_v59  ;;  %v278_v0 = vsel %vm277_vm6, %v1190_v39, 0  ;;  %v210_v2 = vsel %vm196_vm8, %v207_v55, %v209_v63 }
  0x51   :  { %v121_v1 = vadd.s32 536870912, %v120_v56  ;;  %v1251_v3 = vmul.u32.u64.low %v1188_v38, %v206_v62  ;;  %v1252_v4 = vmul.u32.u64.high %v1188_v38, %v206_v62, %v1251_v3  ;;  %v273_v7 = vand.u32 8388607, %v266_v35 }
  0x52   :  { %v1256_v5 = vmul.u32.u64.low %v1188_v38, %v210_v2  ;;  %v1257_v6 = vmul.u32.u64.high %v1188_v38, %v210_v2, %v1256_v5  ;;  %v280_v13 = vand.u32 31, %v278_v0  ;;  %v369_v39 = vand.u32 2147483647, %v1183_v31 }
  0x53   :  { %v1261_v8 = vshrl.u32 %v121_v1, 30  ;;  %v218_v51 = vmul.u32 %v1188_v38, %v202_v61  ;;  %v221_v16 = vadd.s32 1, %v1252_v4  ;;  %v274_v18 = vor.u32 8388608, %v273_v7 }
  0x54   :  { %v281_v17 = vsub.s32 32, %v280_v13  ;;  %vm220_vm12 = vc.u32 %v1257_v6, %v1251_v3  ;;  %v372_v19 = vand.u32 2139095040, %v1183_v31  ;;  %v1273_v22 = vshrl.u32 %v278_v0, 5 }
  0x55   :  { %v123_v15 = vshll.u32 %v1261_v8, 30  ;;  %v222_v21 = vsel %vm220_vm12, %v221_v16, %v1252_v4  ;;  %v1277_v38 = vand.u32 8388607, %v369_v39  ;;  %v283_v26 = vshll.u32 %v1106_v41, %v280_v13 }
  0x56   :  { %v223_v23 = vadd.s32 %v222_v21, %v218_v51  ;;  %v284_v27 = vshrl.u32 %v1107_v43, %v281_v17  ;;  %v286_v28 = vshll.u32 %v1107_v43, %v280_v13  ;;  %v287_v30 = vshrl.u32 %v1108_v45, %v281_v17 }
  0x57   :  { %v1270_v20 = vsub.s32 %v120_v56, %v123_v15  ;;  %v289_v32 = vshll.u32 %v1108_v45, %v280_v13  ;;  %v290_v33 = vshrl.u32 %v1109_v47, %v281_v17  ;;  %v292_v40 = vshll.u32 %v1109_v47, %v280_v13 }
  0x58   :  { %v224_v34 = vadd.s32 536870912, %v223_v23  ;;  %v1287_v42 = vshll.u32 %v274_v18, 8  ;;  %v373_v44 = vshrl.u32 %v372_v19, 23  ;;  %v116_v46 = vadd.s32 %v1222_v25, %v1219_v24 }
  0x59   :  { %v126_v29 = vsub.s32 0, %v1270_v20  ;;  %v282_v50 = vshrl.u32 %v1106_v41, %v281_v17  ;;  %vm301_vm13 = vcmp.lt.s32.totalorder %v1273_v22, 4  ;;  %v285_v52 = vor.u32 %v284_v27, %v283_v26 }
  0x5a   :  { %v225_v37 = vshrl.u32 %v224_v34, 30  ;;  %v293_v36 = vshrl.u32 %v1110_v49, %v281_v17  ;;  %v295_v53 = vshll.u32 %v1110_v49, %v280_v13  ;;  %v288_v55 = vor.u32 %v287_v30, %v286_v28 }
  0x5b   :  { %v931_v48 = vmin.u32 %v126_v29, %v1270_v20  ;;  %v291_v56 = vor.u32 %v290_v33, %v289_v32  ;;  %v296_v58 = vshrl.u32 %v1111_v57, %v281_v17  ;;  %vm298_vm14 = vcmp.lt.s32.totalorder %v1273_v22, 1 }
  0x5c   :  { %v226_v59 = vshll.u32 %v225_v37, 30  ;;  %v294_v60 = vor.u32 %v293_v36, %v292_v40  ;;  %vm300_vm15 = vcmp.lt.s32.totalorder %v1273_v22, 3  ;;  %v942_v62 = vadd.s32 4294967169, %v373_v44 }
  0x5d   :  { %v128_v54 = vclz %v931_v48  ;;  %v297_v25 = vor.u32 %v296_v58, %v295_v53  ;;  %v303_v61 = vsel %vm301_vm13, %v291_v56, 2102212464  ;;  %vm299_vm1 = vcmp.lt.s32.totalorder %v1273_v22, 2 }
  0x5e   :  { %v1302_v63 = vsub.s32 %v223_v23, %v226_v59  ;;  %v302_v0 = vsel %vm298_vm14, %v282_v50, %v285_v52  ;;  %v307_v1 = vsel %vm301_vm13, %v294_v60, 920167782  ;;  %vm165_vm3 = vcmp.lt.s32.totalorder %v1170_v10, 0 }
  0x5f   :  { %v932_v24 = vadd.s32 4294967294, %v128_v54  ;;  %v306_v2 = vsel %vm298_vm14, %v285_v52, %v288_v55  ;;  %v308_v4 = vsel %vm300_vm15, %v291_v56, %v307_v1  ;;  %v311_v5 = vsel %vm301_vm13, %v297_v25, 1326507024 }
  0x60   :  { %v229_v13 = vsub.s32 0, %v1302_v63  ;;  %v304_v51 = vsel %vm300_vm15, %v288_v55, %v303_v61  ;;  %v310_v15 = vsel %vm298_vm14, %v288_v55, %v291_v56  ;;  %vm1323_vm4 = vcmp.le.f32.partialorder %v60_v12, 0.7853982 }
  0x61   :  { %vm933_vm2 = vcmp.lt.s32.totalorder %v932_v24, 0  ;;  %v312_v21 = vsel %vm300_vm15, %v294_v60, %v311_v5  ;;  %v146_v23 = vsub.s32 4, %v1261_v8  ;;  %v249_v27 = vsub.s32 4, %v225_v37 }
  0x62   :  { %v131_v7 = vsel %vm933_vm2, 0, %v932_v24  ;;  %v935_v26 = vmin.u32 %v229_v13, %v1302_v63  ;;  %v309_v28 = vsel %vm299_vm1, %v306_v2, %v308_v4  ;;  %vm1336_vm5 = vcmp.le.f32.partialorder %v163_v14, 0.7853982 }
  0x63   :  { %v132_v17 = vsub.s32 32, %v131_v7  ;;  %v133_v18 = vshll.u32 %v1270_v20, %v131_v7  ;;  %v136_v19 = vsub.s32 4294967266, %v131_v7  ;;  %v305_v20 = vsel %vm299_vm1, %v302_v0, %v304_v51 }
  0x64   :  { %v313_v32 = vsel %vm299_vm1, %v310_v15, %v312_v21  ;;  %v231_v33 = vclz %v935_v26  ;;  %v379_v44 = vadd.s32 1, %v942_v62  ;;  %v219_v52 = vadd.s32 %v1251_v3, %v1257_v6 }
  0x65   :  { %v134_v29 = vshrl.u32 %v116_v46, %v132_v17  ;;  %v137_v12 = vadd.s32 127, %v136_v19  ;;  %v1345_v34 = vmul.u32.u64.low %v1287_v42, %v313_v32  ;;  %v1346_v40 = vmul.u32.u64.high %v1287_v42, %v313_v32, %v1345_v34 }
  0x66   :  { %v1349_v50 = vmul.u32.u64.low %v1287_v42, %v309_v28  ;;  %v1350_v14 = vmul.u32.u64.high %v1287_v42, %v309_v28, %v1349_v50  ;;  %v936_v36 = vadd.s32 4294967294, %v231_v33  ;;  %v377_v22 = vor.u32 8388608, %v1277_v38 }
  0x67   :  { %v135_v46 = vor.u32 %v134_v29, %v133_v18  ;;  %v138_v48 = vshll.u32 %v137_v12, 23  ;;  %vm380_vm6 = vcmp.gt.s32.totalorder %v379_v44, 0  ;;  %v147_v55 = vsel %vm62_vm0, %v146_v23, %v1261_v8 }
  0x68   :  { %v381_v56 = vsel %vm380_vm6, %v379_v44, 0  ;;  %vm937_vm7 = vcmp.lt.s32.totalorder %v936_v36, 0  ;;  %v250_v58 = vsel %vm165_vm3, %v249_v27, %v225_v37  ;;  %v321_v59 = vmul.u32 %v1287_v42, %v305_v20 }
  0x69   :  { %v139_v53 = vor.u32 4788187, %v138_v48  ;;  %v142_v54 = vcvt.s32.f32 %v135_v46  ;;  %vm323_vm8 = vc.u32 %v1346_v40, %v1349_v50  ;;  %v234_v6 = vsel %vm937_vm7, 0, %v936_v36 }
  0x6a   :  { %v324_v60 = vadd.s32 1, %v1350_v14  ;;  %v383_v24 = vand.u32 31, %v381_v56  ;;  %v149_v25 = vsel %vm1323_vm4, 0, %v147_v55  ;;  %v235_v61 = vsub.s32 32, %v234_v6 }
  0x6b   :  { %v140_v3 = vand.u32 2147483647, %v139_v53  ;;  %v236_v8 = vshll.u32 %v1302_v63, %v234_v6  ;;  %v239_v62 = vsub.s32 4294967266, %v234_v6  ;;  %v1368_v1 = vand.u32 3, %v149_v25 }
  0x6c   :  { %v325_v42 = vsel %vm323_vm8, %v324_v60, %v1350_v14  ;;  %v384_v37 = vsub.s32 32, %v383_v24  ;;  %v237_v2 = vshrl.u32 %v219_v52, %v235_v61  ;;  %v1373_v5 = vsel %vm1336_vm5, 0, %v250_v58 }
  0x6d   :  { %v143_v0 = vmul.f32 %v142_v54, %v140_v3  ;;  %v240_v4 = vadd.s32 127, %v239_v62  ;;  %v326_v7 = vadd.s32 %v325_v42, %v321_v59  ;;  %v1375_v51 = vshrl.u32 %v381_v56, 5 }
  0x6e   :  { %v386_v15 = vshll.u32 %v1106_v41, %v383_v24  ;;  %v389_v63 = vshll.u32 %v1107_v43, %v383_v24  ;;  %v238_v17 = vor.u32 %v237_v2, %v236_v8  ;;  %v387_v21 = vshrl.u32 %v1107_v43, %v384_v37 }
  0x6f   :  { %v144_v13 = vxor.u32 2147483648, %v143_v0  ;;  %v241_v18 = vshll.u32 %v240_v4, 23  ;;  %v327_v19 = vadd.s32 536870912, %v326_v7  ;;  %v390_v26 = vshrl.u32 %v1108_v45, %v384_v37 }
  0x70   :  { %v392_v27 = vshll.u32 %v1108_v45, %v383_v24  ;;  %v393_v28 = vshrl.u32 %v1109_v47, %v384_v37  ;;  %v245_v20 = vcvt.s32.f32 %v238_v17  ;;  %v385_v43 = vshrl.u32 %v1106_v41, %v384_v37 }
  0x71   :  { %v145_v23 = vsel %vm62_vm0, %v144_v13, %v143_v0  ;;  %v242_v12 = vor.u32 4788187, %v241_v18  ;;  %v1388_v32 = vshrl.u32 %v327_v19, 30  ;;  %v395_v33 = vshll.u32 %v1109_v47, %v383_v24 }
  0x72   :  { %v148_v29 = vsel %vm1323_vm4, %v1168_v9, %v145_v23  ;;  %v396_v34 = vshrl.u32 %v1110_v49, %v384_v37  ;;  %v388_v46 = vor.u32 %v387_v21, %v386_v15  ;;  %vm158_vm9 = vcmp.eq.s32.totalorder %v1368_v1, 2 }
  0x73   :  { %990 = vcosq.f32 %v148_v29  ;;  %v243_v44 = vand.u32 2147483647, %v242_v12  ;;  %v329_v45 = vshll.u32 %v1388_v32, 30  ;;  %v391_v16 = vor.u32 %v390_v26, %v389_v63 }
  0x74   :  { %992 = vsinq.f32 %v148_v29  ;;  %v397_v48 = vor.u32 %v396_v34, %v395_v33  ;;  %v398_v14 = vshll.u32 %v1110_v49, %v383_v24  ;;  %v399_v52 = vshrl.u32 %v1111_v57, %v384_v37 }
  0x75   :  { %v246_v36 = vmul.f32 %v245_v20, %v243_v44  ;;  %v1397_v53 = vsub.s32 %v326_v7, %v329_v45  ;;  %v394_v41 = vor.u32 %v393_v28, %v392_v27  ;;  %vm401_vm10 = vcmp.lt.s32.totalorder %v1375_v51, 1 }
  0x76   :  { %vm154_vm11 = vcmp.lt.s32.totalorder %v1368_v1, 2  ;;  %v400_v47 = vor.u32 %v399_v52, %v398_v14  ;;  %vm403_vm12 = vcmp.lt.s32.totalorder %v1375_v51, 3  ;;  %vm404_vm13 = vcmp.lt.s32.totalorder %v1375_v51, 4 }
  0x77   :  { %v417_v54 = vshll.u32 %v377_v22, 8  ;;  %vm152_vm14 = vweird.f32 %v1168_v9  ;;  %v247_v49 = vxor.u32 2147483648, %v246_v36  ;;  %v332_v57 = vsub.s32 0, %v1397_v53 }
  0x78   :  { %v405_v55 = vsel %vm401_vm10, %v385_v43, %v388_v46  ;;  %v406_v56 = vsel %vm404_vm13, %v394_v41, 2102212464  ;;  %vm402_vm15 = vcmp.lt.s32.totalorder %v1375_v51, 2  ;;  %v409_v38 = vsel %vm401_vm10, %v388_v46, %v391_v16 }
  0x79   :  { %v407_v58 = vsel %vm403_vm12, %v391_v16, %v406_v56  ;;  %v410_v22 = vsel %vm404_vm13, %v397_v48, 920167782  ;;  %v248_v59 = vsel %vm165_vm3, %v247_v49, %v246_v36  ;;  %v1421_v3 = vand.u32 3, %v1373_v5 }
  0x7a   :  { %v939_v6 = vmin.u32 %v332_v57, %v1397_v53  ;;  %v569_v60 = vadd.s32 3, %v149_v25  ;;  %v251_v24 = vsel %vm1336_vm5, %v1170_v10, %v248_v59  ;;  %v408_v61 = vsel %vm402_vm15, %v405_v55, %v407_v58 }
  0x7b   :  { %v411_v8 = vsel %vm403_vm12, %v394_v41, %v410_v22  ;;  %v413_v62 = vsel %vm401_vm10, %v391_v16, %v394_v41  ;;  %994 = vcosq.f32 %v251_v24  ;;  %v414_v25 = vsel %vm404_vm13, %v400_v47, 1326507024 }
  0x7c   :  { %v334_v0 = vclz %v939_v6  ;;  %v412_v42 = vsel %vm402_vm15, %v409_v38, %v411_v8  ;;  %996 = vsinq.f32 %v251_v24  ;;  %v415_v30 = vsel %vm403_vm12, %v397_v48, %v414_v25 }
  0x7d   :  { %v991_v37 = vpop.eup %990  ;;  %v1439_v2 = vmul.u32.u64.low %v417_v54, %v412_v42  ;;  %v1440_v4 = vmul.u32.u64.high %v417_v54, %v412_v42, %v1439_v2  ;;  %vm155_vm0 = vcmp.eq.s32.totalorder %v1368_v1, 0  ;;  %v416_v63 = vsel %vm402_vm15, %v413_v62, %v415_v30 }
  0x7e   :  { %v993_v7 = vpop.eup %992  ;;  %v159_v13 = vxor.u32 2147483648, %v991_v37  ;;  %v940_v15 = vadd.s32 4294967294, %v334_v0  ;;  %vm258_vm1 = vcmp.eq.s32.totalorder %v1421_v3, 0  ;;  %v570_v21 = vand.u32 3, %v569_v60 }
  0x7f   :  { %v156_v17 = vxor.u32 2147483648, %v993_v7  ;;  %v1447_v18 = vmul.u32.u64.low %v417_v54, %v416_v63  ;;  %v1448_v19 = vmul.u32.u64.high %v417_v54, %v416_v63, %v1447_v18  ;;  %vm257_vm2 = vcmp.lt.s32.totalorder %v1421_v3, 2 }
  0x80   :  { %v160_v23 = vsel %vm158_vm9, %v159_v13, %v993_v7  ;;  %v322_v26 = vadd.s32 %v1349_v50, %v1346_v40  ;;  %vm941_vm3 = vcmp.lt.s32.totalorder %v940_v15, 0  ;;  %v424_v27 = vmul.u32 %v417_v54, %v408_v61 }
  0x81   :  { %v157_v28 = vsel %vm155_vm0, %v991_v37, %v156_v17  ;;  %vm255_vm4 = vweird.f32 %v1170_v10  ;;  %v337_v51 = vsel %vm941_vm3, 0, %v940_v15  ;;  %v427_v29 = vadd.s32 1, %v1440_v4 }
  0x82   :  { %v673_v12 = vadd.s32 3, %v1373_v5  ;;  %v161_v20 = vsel %vm154_vm11, %v157_v28, %v160_v23  ;;  %v338_v43 = vsub.s32 32, %v337_v51  ;;  %v339_v33 = vshll.u32 %v1397_v53, %v337_v51 }
  0x83   :  { %v342_v34 = vsub.s32 4294967266, %v337_v51  ;;  %v162_v40 = vsel %vm152_vm14, nan, %v161_v20  ;;  %vm426_vm5 = vc.u32 %v1448_v19, %v1439_v2  ;;  %vm571_vm6 = vcmp.lt.s32.totalorder %v570_v21, 2 }
  0x84   :  { %vm572_vm7 = vcmp.eq.s32.totalorder %v570_v21, 0  ;;  %472 = vst [vmem:[#allocation7] sm:$0xff] %v162_v40  ;;  %v340_v50 = vshrl.u32 %v322_v26, %v338_v43  ;;  %v428_v5 = vsel %vm426_vm5, %v427_v29, %v1440_v4  ;;  %vm261_vm8 = vcmp.eq.s32.totalorder %v1421_v3, 2 }
  0x85   :  { %v343_v44 = vadd.s32 127, %v342_v34  ;;  %v574_v45 = vsel %vm572_vm7, %v991_v37, %v156_v17  ;;  %v429_v1 = vadd.s32 %v428_v5, %v424_v27  ;;  %vm575_vm9 = vcmp.eq.s32.totalorder %v570_v21, 2  ;;  %v995_v16 = vpop.eup %994 }
  0x86   :  { %v674_v46 = vand.u32 3, %v673_v12  ;;  %v341_v48 = vor.u32 %v340_v50, %v339_v33  ;;  %v352_v52 = vsub.s32 4, %v1388_v32  ;;  %v577_v36 = vsel %vm575_vm9, %v159_v13, %v993_v7  ;;  %v997_v53 = vpop.eup %996 }
  0x87   :  { %v344_v14 = vshll.u32 %v343_v44, 23  ;;  %v262_v41 = vxor.u32 2147483648, %v995_v16  ;;  %v430_v47 = vadd.s32 536870912, %v429_v1  ;;  %v578_v54 = vsel %vm571_vm6, %v574_v45, %v577_v36 }
  0x88   :  { %vm675_vm10 = vcmp.lt.s32.totalorder %v674_v46, 2  ;;  %v259_v49 = vxor.u32 2147483648, %v997_v53  ;;  %v348_v55 = vcvt.s32.f32 %v341_v48  ;;  %v579_v56 = vsel %vm152_vm14, nan, %v578_v54 }
  0x89   :  { %v345_v57 = vor.u32 4788187, %v344_v14  ;;  %v263_v58 = vsel %vm261_vm8, %v262_v41, %v997_v53  ;;  %v1473_v38 = vshrl.u32 %v430_v47, 30  ;;  %892 = vst [vmem:[#allocation8] sm:$0xff] %v579_v56  ;;  %vm676_vm11 = vcmp.eq.s32.totalorder %v674_v46, 0 }
  0x8a   :  { %vm679_vm12 = vcmp.eq.s32.totalorder %v674_v46, 2  ;;  %v260_v22 = vsel %vm258_vm1, %v995_v16, %v259_v49  ;;  %v678_v6 = vsel %vm676_vm11, %v995_v16, %v259_v49  ;;  %vm268_vm13 = vcmp.lt.s32.totalorder %v1172_v11, 0 }
  0x8b   :  { %v346_v59 = vand.u32 2147483647, %v345_v57  ;;  %v681_v60 = vsel %vm679_vm12, %v262_v41, %v997_v53  ;;  %v264_v24 = vsel %vm257_vm2, %v260_v22, %v263_v58  ;;  %v432_v9 = vshll.u32 %v1473_v38, 30 }
  0x8c   :  { %v682_v61 = vsel %vm675_vm10, %v678_v6, %v681_v60  ;;  %v265_v8 = vsel %vm255_vm4, nan, %v264_v24  ;;  %vm267_vm14 = vcmp.le.f32.partialorder %v266_v35, 0.7853982  ;;  %v353_v25 = vsel %vm268_vm13, %v352_v52, %v1388_v32 }
  0x8d   :  { %v349_v62 = vmul.f32 %v348_v55, %v346_v59  ;;  %v683_v0 = vsel %vm255_vm4, nan, %v682_v61  ;;  %473 = vst [vmem:[#allocation7 + $0x8] sm:$0xff] %v265_v8  ;;  %v433_v42 = vsub.s32 %v429_v1, %v432_v9  ;;  %v355_v7 = vsel %vm267_vm14, 0, %v353_v25 }
  0x8e   :  { %893 = vst [vmem:[#allocation8 + $0x8] sm:$0xff] %v683_v0  ;;  %v777_v15 = vadd.s32 3, %v355_v7  ;;  %v425_v17 = vadd.s32 %v1439_v2, %v1448_v19  ;;  %v359_v18 = vand.u32 3, %v355_v7  ;;  %vm358_vm4 = vweird.f32 %v1172_v11 }
  0x8f   :  { %v350_v3 = vxor.u32 2147483648, %v349_v62  ;;  %v435_v37 = vsub.s32 0, %v433_v42  ;;  %v455_v1 = vsub.s32 4, %v1473_v38  ;;  %vm371_vm7 = vcmp.lt.s32.totalorder %v1183_v31, 0 }
  0x90   :  { %v778_v21 = vand.u32 3, %v777_v15  ;;  %vm361_vm0 = vcmp.eq.s32.totalorder %v359_v18, 0  ;;  %vm364_vm1 = vcmp.eq.s32.totalorder %v359_v18, 2  ;;  %vm360_vm5 = vcmp.lt.s32.totalorder %v359_v18, 2 }
  0x91   :  { %v351_v30 = vsel %vm268_vm13, %v350_v3, %v349_v62  ;;  %v943_v13 = vmin.u32 %v435_v37, %v433_v42  ;;  %vm370_vm8 = vcmp.le.f32.partialorder %v369_v39, 0.7853982  ;;  %v456_v52 = vsel %vm371_vm7, %v455_v1, %v1473_v38 }
  0x92   :  { %v354_v4 = vsel %vm267_vm14, %v1172_v11, %v351_v30  ;;  %vm783_vm2 = vcmp.eq.s32.totalorder %v778_v21, 2  ;;  %vm780_vm3 = vcmp.eq.s32.totalorder %v778_v21, 0  ;;  %vm779_vm6 = vcmp.lt.s32.totalorder %v778_v21, 2 }
  0x93   :  { %998 = vcosq.f32 %v354_v4  ;;  %v437_v10 = vclz %v943_v13  ;;  %v458_v41 = vsel %vm370_vm8, 0, %v456_v52 }
  0x94   :  { %1000 = vsinq.f32 %v354_v4  ;;  %v881_v47 = vadd.s32 3, %v458_v41  ;;  %v462_v54 = vand.u32 3, %v458_v41 }
  0x95   :  { %v944_v63 = vadd.s32 4294967294, %v437_v10 }
  0x96   :  { %v882_v49 = vand.u32 3, %v881_v47  ;;  %vm467_vm9 = vcmp.eq.s32.totalorder %v462_v54, 2  ;;  %vm464_vm11 = vcmp.eq.s32.totalorder %v462_v54, 0  ;;  %vm463_vm13 = vcmp.lt.s32.totalorder %v462_v54, 2 }
  0x97   :  { %vm945_vm15 = vcmp.lt.s32.totalorder %v944_v63, 0 }
  0x98   :  { %v440_v35 = vsel %vm945_vm15, 0, %v944_v63  ;;  %vm887_vm10 = vcmp.eq.s32.totalorder %v882_v49, 2  ;;  %vm884_vm12 = vcmp.eq.s32.totalorder %v882_v49, 0  ;;  %vm883_vm14 = vcmp.lt.s32.totalorder %v882_v49, 2 }
  0x99   :  { %v441_v23 = vsub.s32 32, %v440_v35  ;;  %v442_v32 = vshll.u32 %v433_v42, %v440_v35  ;;  %v445_v26 = vsub.s32 4294967266, %v440_v35  ;;  %vm461_vm15 = vweird.f32 %v1183_v31 }
  0x9b   :  { %v443_v27 = vshrl.u32 %v425_v17, %v441_v23  ;;  %v446_v28 = vadd.s32 127, %v445_v26 }
  0x9d   :  { %v999_v51 = vpop.eup %998  ;;  %v444_v20 = vor.u32 %v443_v27, %v442_v32  ;;  %v447_v43 = vshll.u32 %v446_v28, 23 }
  0x9e   :  { %v1001_v29 = vpop.eup %1000  ;;  %v365_v12 = vxor.u32 2147483648, %v999_v51 }
  0x9f   :  { %v362_v2 = vxor.u32 2147483648, %v1001_v29  ;;  %v448_v33 = vor.u32 4788187, %v447_v43  ;;  %v451_v34 = vcvt.s32.f32 %v444_v20 }
  0xa0   :  { %v366_v19 = vsel %vm364_vm1, %v365_v12, %v1001_v29  ;;  %v785_v40 = vsel %vm783_vm2, %v365_v12, %v1001_v29 }
  0xa1   :  { %v363_v50 = vsel %vm361_vm0, %v999_v51, %v362_v2  ;;  %v782_v44 = vsel %vm780_vm3, %v999_v51, %v362_v2  ;;  %v449_v45 = vand.u32 2147483647, %v448_v33 }
  0xa2   :  { %v367_v5 = vsel %vm360_vm5, %v363_v50, %v366_v19  ;;  %v786_v46 = vsel %vm779_vm6, %v782_v44, %v785_v40 }
  0xa3   :  { %v368_v16 = vsel %vm358_vm4, nan, %v367_v5  ;;  %v787_v48 = vsel %vm358_vm4, nan, %v786_v46  ;;  %v452_v14 = vmul.f32 %v451_v34, %v449_v45 }
  0xa4   :  { %474 = vst [vmem:[#allocation7 + $0x10] sm:$0xff] %v368_v16  ;;  %894 = vst [vmem:[#allocation8 + $0x10] sm:$0xff] %v787_v48 }
  0xa5   :  { %v453_v11 = vxor.u32 2147483648, %v452_v14 }
  0xa7   :  { %v454_v36 = vsel %vm371_vm7, %v453_v11, %v452_v14 }
  0xa8   :  { %v457_v53 = vsel %vm370_vm8, %v1183_v31, %v454_v36 }
  0xa9   :  { %1002 = vcosq.f32 %v457_v53 }
  0xaa   :  { %1004 = vsinq.f32 %v457_v53 }
  0xb3   :  { %v1003_v57 = vpop.eup %1002 }
  0xb4   :  { %v1005_v55 = vpop.eup %1004  ;;  %v468_v56 = vxor.u32 2147483648, %v1003_v57 }
  0xb5   :  { %v465_v39 = vxor.u32 2147483648, %v1005_v55 }
  0xb6   :  { %v469_v58 = vsel %vm467_vm9, %v468_v56, %v1005_v55  ;;  %v889_v38 = vsel %vm887_vm10, %v468_v56, %v1005_v55 }
  0xb7   :  { %v466_v22 = vsel %vm464_vm11, %v1003_v57, %v465_v39  ;;  %v886_v59 = vsel %vm884_vm12, %v1003_v57, %v465_v39 }
  0xb8   :  { %v470_v6 = vsel %vm463_vm13, %v466_v22, %v469_v58  ;;  %v890_v60 = vsel %vm883_vm14, %v886_v59, %v889_v38 }
  0xb9   :  { %v471_v24 = vsel %vm461_vm15, nan, %v470_v6  ;;  %v891_v9 = vsel %vm461_vm15, nan, %v890_v60 }
  0xba   :  { %475 = vst [vmem:[#allocation7 + $0x18] sm:$0xff] %v471_v24  ;;  %895 = vst [vmem:[#allocation8 + $0x18] sm:$0xff] %v891_v9 }
  0xbb   :  { %1061 = shalt.err (!%p1058_p6)
}
  0xbc   :  { %s1062_s17 = scalar_lea.hbm %s1540_s2, 512 }
  0xbd   :  { %p1063_p7 = scmp.ne.s32.totalorder %s1540_s2, %s1062_s17  ;;  %p1066_p8 = scmp.lt.u32.totalorder %s1062_s17, %s1540_s2 }
  0xbf   :  { %p1068_p9 = pnand %p1066_p8, %p1063_p7 }
  0xc1   :  { %1071 = shalt.err (!%p1068_p9)
}
  0xc2   :  { %907 = dma.vmem_to_hbm [thread:$0]  %s902_s11, 512, %s1540_s2, [#allocation4], %s1104_s0, %s1104_s0, %s1105_s8  }
  0xc3   :  { %s1072_s24 = scalar_lea.vmem %s1501_s13, 512  ;;  %p1077_p11 = scmp.lt.s32.totalorder %s1501_s13, %s1501_s13 }
  0xc4   :  { %p1073_p10 = scmp.ne.s32.totalorder %s1501_s13, %s1072_s24  ;;  %p1078_p12 = scmp.lt.s32.totalorder %s1072_s24, %s1072_s24 }
  0xc6   :  { %p1079_p13 = por %p1078_p12, %p1077_p11 }
  0xc8   :  { %p1080_p0 = pnand %p1079_p13, %p1073_p10 }
  0xca   :  { %1083 = shalt.err (!%p1080_p0)
}
  0xcb   :  { %s1084_s27 = scalar_lea.hbm %s1541_s3, 512 }
  0xcc   :  { %p1085_p1 = scmp.ne.s32.totalorder %s1541_s3, %s1084_s27  ;;  %p1088_p2 = scmp.lt.u32.totalorder %s1084_s27, %s1541_s3 }
  0xce   :  { %p1090_p3 = pnand %p1088_p2, %p1085_p1 }
  0xd0   :  { %1093 = shalt.err (!%p1090_p3)
}
  0xd1   :  { %919 = dma.vmem_to_hbm [thread:$0]  %s1501_s13, 512, %s1541_s3, [#allocation9], %s1104_s0, %s1104_s0, %s1105_s8  }
  0xd2   :  { %1098 = dma.done.wait [#allocation4], 512  }
  0xd3   :  { %1099 = vsyncadd [#allocation4], 4294966784 }
  0xd4   :  { %1100 = dma.done.wait [#allocation9], 512  }
  0xd5   :  { %1101 = vsyncadd [#allocation9], 4294966784 }
  0xd6   :  { %926 = vsyncpa [#allocation3], 1 }
  0xd7   :  { %927 = vsyncpa [#allocation6], 1 }
  0xd8   :  { %928 = vsyncpa [#allocation4], 1 }
  0xd9   :  { %929 = vsyncpa [#allocation9], 1 }

</bundles_post_ra>
